<compile_context>
chip_gen: v7x
topology: tpu7x:2x2x1
jax: 0.10.0
libtpu: 0.0.40
codegen_flags: <defaults>
</compile_context>

<pallas_src>
import jax
import jax.numpy as jnp
from jax.experimental import pallas as pl
from jax.experimental.pallas import tpu as pltpu


def _round_up(x: int, m: int) -> int:
    return ((x + m - 1) // m) * m


def _i2o_kernel(x_ref, w_ref, b_ref, o_ref):
    # x_ref: (TM, 1)   w_ref: (1, O_pad)   b_ref: (1, O_pad)   o_ref: (TM, O_pad)
    # Linear(1, O): y = x @ W^T + b  ==  broadcasted mul + add (VPU elementwise).
    # Kernel is HBM-write bound; keep it off the MXU.
    o_ref[...] = x_ref[...] * w_ref[...] + b_ref[...]


def _i2o_pallas(x2d, w_row, b_row, out_size):
    """x2d: (M, 1), w_row/b_row: (1, out_size). Returns (M, out_size)."""
    m = x2d.shape[0]
    dtype = x2d.dtype

    # Lane-dense output: pad O up to a multiple of 128.
    o_pad = _round_up(max(out_size, 1), 128)

    # Tile the row axis.  Per-row VMEM cost (f32, double-buffered):
    #   output tile: 2 * o_pad * 4 bytes
    #   x tile:      2 * 128  * 4 bytes  (a (TM, 1) block pads lanes to 128)
    # Keep the working set ~8 MiB so it fits the scoped-VMEM default on every
    # generation (16 MiB v5e, 32 MiB v6e/v7x scoped; 64 MiB physical on v7x).
    vmem_budget = 8 * 1024 * 1024
    per_row_bytes = 2 * 4 * (o_pad + 128)
    tm = (vmem_budget // per_row_bytes) // 8 * 8
    tm = max(8, min(1024, tm, _round_up(m, 8)))
    m_pad = _round_up(max(m, 1), tm)

    # Wrapper-side padding to tile-divisible, lane/sublane-aligned shapes.
    x_p = jnp.zeros((m_pad, 1), dtype).at[:m, :].set(x2d)
    w_p = jnp.zeros((1, o_pad), dtype).at[:, :out_size].set(w_row.astype(dtype))
    b_p = jnp.zeros((1, o_pad), dtype).at[:, :out_size].set(b_row.astype(dtype))

    grid = (m_pad // tm,)
    cost = pl.CostEstimate(
        flops=2 * m_pad * o_pad,
        transcendentals=0,
        bytes_accessed=4 * (m_pad + 2 * o_pad + m_pad * o_pad),
    )

    out_p = pl.pallas_call(
        _i2o_kernel,
        out_shape=jax.ShapeDtypeStruct((m_pad, o_pad), dtype),
        grid_spec=pltpu.PrefetchScalarGridSpec(
            num_scalar_prefetch=0,
            grid=grid,
            in_specs=[
                pl.BlockSpec((tm, 1), lambda i: (i, 0)),
                pl.BlockSpec((1, o_pad), lambda i: (0, 0)),
                pl.BlockSpec((1, o_pad), lambda i: (0, 0)),
            ],
            out_specs=pl.BlockSpec((tm, o_pad), lambda i: (i, 0)),
        ),
        compiler_params=pltpu.CompilerParams(
            dimension_semantics=("parallel",),
            vmem_limit_bytes=32 * 1024 * 1024,
        ),
        cost_estimate=cost,
    )(x_p, w_p, b_p)

    return out_p[:m, :out_size]


def decoder_forward(inp, hidden, w_i2o, b_i2o, *, force_pallas=True):
    """Pallas equivalent of Decoder.forward.

    Args:
      inp:    (seq, batch, 1) float32
      hidden: (1, batch, hidden_size) float32 (passed through unchanged)
      w_i2o:  (output_size, 1) float32   -- PyTorch Linear weight layout
      b_i2o:  (output_size,)   float32
    Returns:
      (output2, hidden) with output2 of shape (seq, batch, output_size)
    """
    seq, batch, in_feat = inp.shape
    assert in_feat == 1, "i2o is Linear(1, output_size)"
    out_size = w_i2o.shape[0]

    m = seq * batch
    x2d = inp.reshape(m, 1)
    # (O, 1) -> (1, O): valid as a reshape only because in_features == 1.
    w_row = w_i2o.reshape(1, out_size)
    b_row = b_i2o.reshape(1, out_size)

    if (not force_pallas) and (m * out_size * 4 < (1 << 20)):
        # Tiny output: pallas_call fixed overhead dominates; let XLA fuse it.
        out2d = x2d * w_row + b_row
    else:
        out2d = _i2o_pallas(x2d, w_row, b_row, out_size)

    output2 = out2d.reshape(seq, batch, out_size)
    return output2, hidden


def _run_case(key, seq, batch, hidden_size, output_size):
    k_in, k_h, k_w, k_b = jax.random.split(key, 4)
    inp = jax.random.normal(k_in, (seq, batch, 1), dtype=jnp.float32)
    hidden = jax.random.normal(k_h, (1, batch, hidden_size), dtype=jnp.float32)
    # PyTorch Linear(1, O) default init: U(-1/sqrt(1), 1/sqrt(1)) = U(-1, 1).
    w_i2o = jax.random.uniform(k_w, (output_size, 1), jnp.float32, -1.0, 1.0)
    b_i2o = jax.random.uniform(k_b, (output_size,), jnp.float32, -1.0, 1.0)

    output2, hidden_out = decoder_forward(inp, hidden, w_i2o, b_i2o,
                                          force_pallas=True)
    jax.block_until_ready((output2, hidden_out))

    ref = inp @ w_i2o.T + b_i2o  # (seq, batch, output_size)
    assert output2.shape == (seq, batch, output_size)
    assert hidden_out.shape == (1, batch, hidden_size)
    assert jnp.allclose(output2, ref, atol=1e-5, rtol=1e-5)
    assert jnp.array_equal(hidden_out, hidden)


if __name__ == "__main__":
    key = jax.random.PRNGKey(0)
    k0, k1 = jax.random.split(key)

    # Case 1: toy shapes consistent with the module's forward.
    _run_case(k0, seq=8, batch=2, hidden_size=32, output_size=16)

    # Case 2: non-divisible M and O -> exercises multi-tile grid, row padding
    # and lane-padding/slicing paths.
    _run_case(k1, seq=128, batch=17, hidden_size=32, output_size=200)

    print("KERNEL_OK")
</pallas_src>

<mosaic_0001>
module attributes {stable_mosaic.version = 11 : i64} {
  func.func @_i2o_kernel(%arg0: i32, %arg1: memref<16x1xf32, #tpu.memory_space<vmem>>, %arg2: memref<1x128xf32, #tpu.memory_space<vmem>>, %arg3: memref<1x128xf32, #tpu.memory_space<vmem>>, %arg4: memref<16x128xf32, #tpu.memory_space<vmem>>) attributes {dimension_semantics = [#tpu.dimension_semantics<parallel>], iteration_bounds = array<i64: 1>, scalar_prefetch = 0 : i64, scratch_operands = 0 : i64, tpu.core_type = #tpu.core_type<tc>, window_params = [{transform_indices = @transform_0, window_bounds = array<i64: 16, 1>}, {pipeline_mode = #tpu.pipeline_mode<synchronous>, transform_indices = @transform_1, window_bounds = array<i64: 1, 128>}, {pipeline_mode = #tpu.pipeline_mode<synchronous>, transform_indices = @transform_2, window_bounds = array<i64: 1, 128>}, {transform_indices = @transform_3, window_bounds = array<i64: 16, 128>}]} {
    %c0 = arith.constant 0 : index
    %c0_0 = arith.constant 0 : index
    %0 = vector.load %arg1[%c0, %c0_0] : memref<16x1xf32, #tpu.memory_space<vmem>>, vector<16x1xf32>
    %c0_1 = arith.constant 0 : index
    %c0_2 = arith.constant 0 : index
    %1 = vector.load %arg2[%c0_1, %c0_2] : memref<1x128xf32, #tpu.memory_space<vmem>>, vector<1x128xf32>
    %2 = vector.broadcast %0 : vector<16x1xf32> to vector<16x128xf32>
    %3 = vector.broadcast %1 : vector<1x128xf32> to vector<16x128xf32>
    %4 = arith.mulf %2, %3 : vector<16x128xf32>
    %c0_3 = arith.constant 0 : index
    %c0_4 = arith.constant 0 : index
    %5 = vector.load %arg3[%c0_3, %c0_4] : memref<1x128xf32, #tpu.memory_space<vmem>>, vector<1x128xf32>
    %6 = vector.broadcast %5 : vector<1x128xf32> to vector<16x128xf32>
    %7 = arith.addf %4, %6 : vector<16x128xf32>
    %c0_5 = arith.constant 0 : index
    %c0_6 = arith.constant 0 : index
    %8 = vector.load %arg4[%c0_5, %c0_6] : memref<16x128xf32, #tpu.memory_space<vmem>>, vector<16x128xf32>
    tpu.vector_store %arg4[%c0_5, %c0_6], %7 {strides = array<i32>} : memref<16x128xf32, #tpu.memory_space<vmem>>, vector<16x128xf32>,
    return
  }
  func.func @transform_0(%arg0: i32) -> (i32, i32) {
    %c0_i32 = arith.constant 0 : i32
    %c0_i32_0 = arith.constant 0 : i32
    return %arg0, %c0_i32 : i32, i32
  }
  func.func @transform_1(%arg0: i32) -> (i32, i32) {
    %c0_i32 = arith.constant 0 : i32
    %c0_i32_0 = arith.constant 0 : i32
    %c0_i32_1 = arith.constant 0 : i32
    return %c0_i32, %c0_i32_0 : i32, i32
  }
  func.func @transform_2(%arg0: i32) -> (i32, i32) {
    %c0_i32 = arith.constant 0 : i32
    %c0_i32_0 = arith.constant 0 : i32
    %c0_i32_1 = arith.constant 0 : i32
    return %c0_i32, %c0_i32_0 : i32, i32
  }
  func.func @transform_3(%arg0: i32) -> (i32, i32) {
    %c0_i32 = arith.constant 0 : i32
    %c0_i32_0 = arith.constant 0 : i32
    return %arg0, %c0_i32 : i32, i32
  }
}

</mosaic_0001>

<bundles_post_ra>
// kernel: tpu_custom_call.1
= control target key start
LH: loop header
LB: loop body
LE: loop exit
PB: predicated region body
PF: predicated region fallthrough
CT: control target
= control target key end

     0   :  { %v94_v1 = vmov 0   ;;  %s142_s0 = inlined_call_operand.vmem [shape: f32[16,1], index: 0, kind: input, shape index: {}]   ;;  %s143_s1 = inlined_call_operand.vmem [shape: f32[1,128], index: 1, kind: input, shape index: {}]   ;;  %s144_s2 = inlined_call_operand.vmem [shape: f32[1,128], index: 2, kind: input, shape index: {}]   ;;  %s145_s3 = inlined_call_operand.hbm [shape: f32[16,128], index: 3, kind: output, shape index: {}]  }
   0x1   :  { %v15_v0 = vld [vmem:[%s142_s0] sm:$0xff]  ;;  %69 = vset.pattern.permute.xlu0 %v94_v1 }
   0x2   :  { %8 = vsyncpa [#allocation3], 0  ;;  %20 = vperm.xlu0 %69, %v15_v0   ;;  %v16_v2 = vld [vmem:[%s142_s0 + $0x8] sm:$0xff]  ;;  %v63_v3 = vld [vmem:[%s143_s1] ss:$0 sm:$0xff]  ;;  %s95_s20 = smov [#allocation2]  }
   0x3   :  { %v64_v4 = vld [vmem:[%s144_s2] ss:$0 sm:$0xff]  ;;  %s52_s21 = sshll.u32 %s95_s20, 4  ;;  %s53_s21 = int_to_ptr.vmem [resolvable:$true] %s52_s21 }
   0x4   :  { %s70_s0 = scalar_lea.vmem %s53_s21, 256  ;;  %p75_p1 = scmp.lt.s32.totalorder %s53_s21, %s53_s21 }
   0x5   :  { %p71_p0 = scmp.ne.s32.totalorder %s53_s21, %s70_s0  ;;  %p76_p2 = scmp.lt.s32.totalorder %s70_s0, %s70_s0 }
   0x6   :  { %25 = vperm.xlu0 %69, %v16_v2  }
   0x7   :  { %p77_p3 = por %p76_p2, %p75_p1 }
   0x9   :  { %p78_p4 = pnand %p77_p3, %p71_p0 }
  0x81   :  { %v21_v5 = vpop.permute.xlu0 %20 }
  0x82   :  { %v34_v6 = vmul.f32 %v63_v3, %v21_v5 }
  0x84   :  { %v43_v7 = vadd.f32 %v64_v4, %v34_v6 }
  0x85   :  { %v26_v8 = vpop.permute.xlu0 %25 }
  0x86   :  { %45 = vst [vmem:[#allocation2] sm:$0xff] %v43_v7  ;;  %v35_v9 = vmul.f32 %v63_v3, %v26_v8 }
  0x88   :  { %v44_v10 = vadd.f32 %v64_v4, %v35_v9 }
  0x8a   :  { %46 = vst [vmem:[#allocation2 + $0x8] sm:$0xff] %v44_v10 }
  0x8b   :  { %81 = shalt.err (!%p78_p4)
}
  0x8c   :  { %s82_s22 = scalar_lea.hbm %s145_s3, 256 }
  0x8d   :  { %p83_p5 = scmp.ne.s32.totalorder %s145_s3, %s82_s22  ;;  %p86_p6 = scmp.lt.u32.totalorder %s82_s22, %s145_s3 }
  0x8f   :  { %p88_p7 = pnand %p86_p6, %p83_p5 }
  0x91   :  { %91 = shalt.err (!%p88_p7)
}
  0x92   :  { %s96_s27 = smov 128   ;;  %s97_s28 = smov 8  }
  0x93   :  { %58 = dma.vmem_to_hbm [thread:$0]  %s53_s21, 256, %s145_s3, [#allocation3], %s96_s27, %s96_s27, %s97_s28  }
  0x94   :  { %92 = dma.done.wait [#allocation3], 256  }
  0x95   :  { %93 = vsyncadd [#allocation3], 4294967040 }
  0x96   :  { %62 = vsyncpa [#allocation3], 1 }

</bundles_post_ra>
